<compile_context>
chip_gen: v6e
topology: v6e:2x2x1
jax: 0.10.0
libtpu: 0.0.40
codegen_flags: <defaults>
</compile_context>

<pallas_src>
import functools

import jax
import jax.numpy as jnp
from jax.experimental import pallas as pl
from jax.experimental.pallas import tpu as pltpu

MXU_DTYPE = jnp.bfloat16               # matmul operands / intermediate activations
_IN_EPS = 1e-5
_LRELU_SLOPE = 0.2
_RSS_EPS = 1e-12                       # reference has no eps; guards 0/0 only


def _vmem_limit_bytes():
    try:
        kind = jax.devices()[0].device_kind.lower()
    except Exception:
        kind = ""
    if "v7" in kind or "tpu7" in kind:
        return 48 * 1024 * 1024        # 64 MiB physical on v7x, leave headroom
    return 100 * 1024 * 1024           # v5e / v6e have 128 MiB physical VMEM


VMEM_LIMIT_BYTES = _vmem_limit_bytes()


def _cparams(dims):
    return pltpu.CompilerParams(dimension_semantics=dims,
                                vmem_limit_bytes=VMEM_LIMIT_BYTES)


def _pick_row_tile(H, W, cin, cout, elem_bytes, budget=6 << 20):
    """Output-row tile for the conv kernel.

    Prefers (a) divisors of H (halo DMA never goes out of bounds),
    (b) lane-dense output blocks (th*W % 128 == 0 or full image),
    (c) fitting a per-step VMEM budget, (d) >= 2 row blocks for megacore.
    """
    def cost(th):
        return (cin * (th + 4) * (W + 4) * (elem_bytes + 2)
                + th * W * (cin * 2 + cout * 12))
    divs = [d for d in range(1, H + 1) if H % d == 0]
    fitting = [d for d in divs if cost(d) <= budget] or [1]
    lane_ok = [d for d in fitting if (d * W) % 128 == 0 or d == H]
    # TODO(synk): masked edge row-tiles for clinical H, W with awkward factors.
    pool = lane_ok if lane_ok else [H]
    multi = [d for d in pool if d < H]
    return max(multi) if multi else max(pool)


def _pick_hw_tile(hw, max_tile=8192):
    """Lane tile for flattened H*W axes: multiple of 128 (>=2 blocks) or full."""
    if hw < 256:
        return hw
    t = min(max_tile, ((hw // 2) // 128) * 128)
    return t if t >= 128 else hw


def _pick_seq_tile(L):
    """Attention sequence tile: divisor of L, multiple of 128 when possible."""
    for cand in (1024, 512, 256, 128):
        if L % cand == 0:
            return cand
    # TODO(synk): masked partial kv/q tiles for sequence lengths with no nice divisor.
    return L


# ======================================================================
# Pallas kernels
# ======================================================================
def _conv_kernel(x_hbm, w_ref, b_ref, sc_ref, sh_ref, o_ref, xbuf, sem, *,
                 KH, KW, H, W, th, ph, pw, in_affine, in_lrelu, out_lrelu):
    """One (sample, row-block): per-tap MXU accumulation over a halo'd block."""
    n = pl.program_id(0)
    r = pl.program_id(1)
    row0 = r * th
    cin = xbuf.shape[0]
    cout = o_ref.shape[1]

    # Halo'd row block (th + 2*ph rows of the zero-padded image) from HBM.
    # TODO(synk): double-buffer this DMA across row blocks / drop the host pad.
    cp = pltpu.make_async_copy(
        x_hbm.at[n, :, pl.ds(row0, th + 2 * ph), :], xbuf, sem)
    cp.start()
    cp.wait()

    xb = xbuf[...].astype(jnp.float32)             # (Cin, th+2ph, W+2pw)
    if in_affine:
        xb = xb * sc_ref[0][:, :, None] + sh_ref[0][:, :, None]
        if in_lrelu:
            xb = jnp.where(xb >= 0, xb, _LRELU_SLOPE * xb)
        if ph or pw:
            # Reference pads with zeros AFTER norm/activation: re-zero the halo.
            rows = row0 + jax.lax.broadcasted_iota(jnp.int32, xb.shape, 1)
            cols = jax.lax.broadcasted_iota(jnp.int32, xb.shape, 2)
            valid = ((rows >= ph) & (rows < ph + H) &
                     (cols >= pw) & (cols < pw + W))
            xb = jnp.where(valid, xb, 0.0)
    xb = xb.astype(MXU_DTYPE)

    acc = jnp.zeros((cout, th * W), jnp.float32)
    for kh in range(KH):
        for kw in range(KW):
            slab = xb[:, kh:kh + th, kw:kw + W].reshape(cin, th * W)
            acc = acc + jnp.dot(w_ref[kh * KW + kw], slab,
                                preferred_element_type=jnp.float32)
    acc = acc + b_ref[...]
    if out_lrelu:
        acc = jnp.where(acc >= 0, acc, _LRELU_SLOPE * acc)
    o_ref[0] = acc.astype(o_ref.dtype)


@functools.partial(jax.jit,
                   static_argnames=("in_lrelu", "lrelu", "out_dtype"))
def pallas_conv2d(x, w, b=None, in_scale=None, in_shift=None, *,
                  in_lrelu=False, lrelu=False, out_dtype=jnp.float32):
    """x: (N, Cin, H, W); w: (KH, KW, Cin, Cout); SAME padding, stride 1.

    Optional fused per-(sample, channel) input affine (+LeakyReLU) and fused
    bias / output LeakyReLU epilogue.
    """
    N, Cin, H, W = x.shape
    KH, KW, _, Cout = w.shape
    ph, pw = KH // 2, KW // 2
    # TODO(synk): fetch the halo straight from the unpadded array to avoid this
    # extra HBM round trip of the activation.
    xp = jnp.pad(x, ((0, 0), (0, 0), (ph, ph), (pw, pw))) if (ph or pw) else x
    WP = W + 2 * pw
    T = KH * KW
    wm = jnp.transpose(w.reshape(T, Cin, Cout), (0, 2, 1)).astype(MXU_DTYPE)
    bcol = (jnp.zeros((Cout,), jnp.float32) if b is None
            else b.astype(jnp.float32)).reshape(Cout, 1)
    in_affine = in_scale is not None
    sc = (jnp.ones((N, Cin), jnp.float32) if in_scale is None
          else in_scale.astype(jnp.float32)).reshape(N, Cin, 1)
    sh = (jnp.zeros((N, Cin), jnp.float32) if in_shift is None
          else in_shift.astype(jnp.float32)).reshape(N, Cin, 1)

    th = _pick_row_tile(H, W, Cin, Cout, x.dtype.itemsize)
    R = H // th

    out = pl.pallas_call(
        functools.partial(_conv_kernel, KH=KH, KW=KW, H=H, W=W, th=th,
                          ph=ph, pw=pw, in_affine=in_affine,
                          in_lrelu=in_lrelu, out_lrelu=lrelu),
        grid=(N, R),
        in_specs=[pl.BlockSpec(memory_space=pl.ANY),                 # x (HBM)
                  pl.BlockSpec((T, Cout, Cin), lambda n, r: (0, 0, 0)),
                  pl.BlockSpec((Cout, 1), lambda n, r: (0, 0)),
                  pl.BlockSpec((1, Cin, 1), lambda n, r: (n, 0, 0)),
                  pl.BlockSpec((1, Cin, 1), lambda n, r: (n, 0, 0))],
        out_specs=pl.BlockSpec((1, Cout, th * W), lambda n, r: (n, 0, r)),
        out_shape=jax.ShapeDtypeStruct((N, Cout, H * W), out_dtype),
        scratch_shapes=[pltpu.VMEM((Cin, th + 2 * ph, WP), x.dtype),
                        pltpu.SemaphoreType.DMA],
        compiler_params=_cparams(("parallel", "parallel")),
    )(xp, wm, bcol, sc, sh)
    return out.reshape(N, Cout, H, W)


def _stats_kernel(x_ref, o_ref, *, hw, t):
    """Per-channel (sum, sum-of-squares) of one HW tile."""
    r = pl.program_id(1)
    x = x_ref[0].astype(jnp.float32)               # (C, t)
    if hw % t:
        col = r * t + jax.lax.broadcasted_iota(jnp.int32, x.shape, 1)
        x = jnp.where(col < hw, x, 0.0)
    s = jnp.sum(x, axis=1, keepdims=True)          # (C, 1)
    q = jnp.sum(x * x, axis=1, keepdims=True)
    o_ref[0, 0] = jnp.concatenate([s, q], axis=1)  # (C, 2)


@jax.jit
def pallas_channel_stats(x):
    """Per-(sample, channel) [sum, sumsq] over H*W; HW-tiled, fully parallel."""
    N, C, H, W = x.shape
    HW = H * W
    t = _pick_hw_tile(HW)
    R = pl.cdiv(HW, t)
    part = pl.pallas_call(
        functools.partial(_stats_kernel, hw=HW, t=t),
        grid=(N, R),
        in_specs=[pl.BlockSpec((1, C, t), lambda n, r: (n, 0, r))],
        out_specs=pl.BlockSpec((1, 1, C, 2), lambda n, r: (n, r, 0, 0)),
        out_shape=jax.ShapeDtypeStruct((N, R, C, 2), jnp.float32),
        compiler_params=_cparams(("parallel", "parallel")),
    )(x.reshape(N, C, HW))
    return jnp.sum(part, axis=1)                   # (N, C, 2)


def _mean_var_from_sums(sums, n, ddof=0):
    # TODO(synk): single-pass E[x^2]-E[x]^2 can cancel when |mean| >> std;
    # prefer a shifted / two-pass accumulation at clinical dynamic ranges.
    s = sums[..., 0]
    q = sums[..., 1]
    mean = s / n
    var = jnp.maximum(q / n - mean * mean, 0.0)
    if ddof:
        var = var * (float(n) / (n - ddof))
    return mean, var


def _affine_kernel(x_ref, sc_ref, sh_ref, o_ref, *, lrelu):
    x = x_ref[0].astype(jnp.float32)               # (C, t)
    y = x * sc_ref[0] + sh_ref[0]
    if lrelu:
        y = jnp.where(y >= 0, y, _LRELU_SLOPE * y)
    o_ref[0] = y.astype(o_ref.dtype)


@functools.partial(jax.jit, static_argnames=("lrelu", "out_dtype"))
def pallas_chan_affine(x, scale, shift, *, lrelu=False, out_dtype=jnp.float32):
    """y = x * scale[n, c] + shift[n, c] (+ optional LeakyReLU), HW-tiled."""
    N, C, H, W = x.shape
    HW = H * W
    t = _pick_hw_tile(HW)
    out = pl.pallas_call(
        functools.partial(_affine_kernel, lrelu=lrelu),
        grid=(N, pl.cdiv(HW, t)),
        in_specs=[pl.BlockSpec((1, C, t), lambda n, r: (n, 0, r)),
                  pl.BlockSpec((1, C, 1), lambda n, r: (n, 0, 0)),
                  pl.BlockSpec((1, C, 1), lambda n, r: (n, 0, 0))],
        out_specs=pl.BlockSpec((1, C, t), lambda n, r: (n, 0, r)),
        out_shape=jax.ShapeDtypeStruct((N, C, HW), out_dtype),
        compiler_params=_cparams(("parallel", "parallel")),
    )(x.reshape(N, C, HW),
      scale.astype(jnp.float32).reshape(N, C, 1),
      shift.astype(jnp.float32).reshape(N, C, 1))
    return out.reshape(N, C, H, W)


def instance_norm_scale_shift(x):
    """InstanceNorm2d(affine=False) as per-(sample, channel) (scale, shift)."""
    _, _, H, W = x.shape
    sums = pallas_channel_stats(x)
    mean, var = _mean_var_from_sums(sums, H * W)
    inv = jax.lax.rsqrt(var + _IN_EPS)
    return inv, -mean * inv


def instance_norm(x, *, lrelu=False, out_dtype=jnp.float32):
    sc, sh = instance_norm_scale_shift(x)
    return pallas_chan_affine(x, sc, sh, lrelu=lrelu, out_dtype=out_dtype)


def _attn_kernel(q_ref, k_ref, v_ref, o_ref, m_sc, l_sc, acc_sc):
    """Flash attention, C-major / L-lane layout, grid (batch, q-block, kv-block)."""
    j = pl.program_id(2)

    @pl.when(j == 0)
    def _():
        m_sc[...] = jnp.full(m_sc.shape, -jnp.inf, jnp.float32)
        l_sc[...] = jnp.zeros(l_sc.shape, jnp.float32)
        acc_sc[...] = jnp.zeros(acc_sc.shape, jnp.float32)

    q = q_ref[0].astype(MXU_DTYPE)                 # (C, tq), scale pre-folded
    k = k_ref[0].astype(MXU_DTYPE)                 # (C, tkv)
    s = jax.lax.dot_general(k, q, (((0,), (0,)), ((), ())),
                            preferred_element_type=jnp.float32)   # (tkv, tq)
    m_prev = m_sc[...]
    m_new = jnp.maximum(m_prev, jnp.max(s, axis=0, keepdims=True))
    alpha = jnp.exp(m_prev - m_new)
    p = jnp.exp(s - m_new)
    l_sc[...] = alpha * l_sc[...] + jnp.sum(p, axis=0, keepdims=True)
    pv = jnp.dot(v_ref[0].astype(MXU_DTYPE), p.astype(MXU_DTYPE),
                 preferred_element_type=jnp.float32)              # (C, tq)
    acc_sc[...] = alpha * acc_sc[...] + pv
    m_sc[...] = m_new

    @pl.when(j == pl.num_programs(2) - 1)
    def _():
        o_ref[0] = (acc_sc[...] / l_sc[...]).astype(o_ref.dtype)


@jax.jit
def pallas_attention(q, k, v):
    """q, k, v: (BA, C, L) -> (BA, C, L).  Softmax over the key axis."""
    BA, C, L = q.shape
    tq = _pick_seq_tile(L)
    tkv = _pick_seq_tile(L)
    return pl.pallas_call(
        _attn_kernel,
        grid=(BA, L // tq, L // tkv),
        in_specs=[pl.BlockSpec((1, C, tq), lambda b, i, j: (b, 0, i)),
                  pl.BlockSpec((1, C, tkv), lambda b, i, j: (b, 0, j)),
                  pl.BlockSpec((1, C, tkv), lambda b, i, j: (b, 0, j))],
        out_specs=pl.BlockSpec((1, C, tq), lambda b, i, j: (b, 0, i)),
        out_shape=jax.ShapeDtypeStruct((BA, C, L), MXU_DTYPE),
        scratch_shapes=[pltpu.VMEM((1, tq), jnp.float32),
                        pltpu.VMEM((1, tq), jnp.float32),
                        pltpu.VMEM((C, tq), jnp.float32)],
        compiler_params=_cparams(("parallel", "parallel", "arbitrary")),
    )(q, k, v)


def _sens_reduce_kernel(xr_ref, xi_ref, sr_ref, si_ref, o_ref):
    xr, xi, sr, si = xr_ref[0], xi_ref[0], sr_ref[0], si_ref[0]   # (C, t)
    re = jnp.sum(xr * sr + xi * si, axis=0, keepdims=True)        # x * conj(s)
    im = jnp.sum(xi * sr - xr * si, axis=0, keepdims=True)
    o_ref[0] = jnp.concatenate([re, im], axis=0)


@jax.jit
def pallas_sens_reduce(xr, xi, sr, si):
    """sum_coils(img * conj(sens)) as channel-format image (B, 2, H, W)."""
    B, C, H, W = xr.shape
    HW = H * W
    t = _pick_hw_tile(HW)
    spec = pl.BlockSpec((1, C, t), lambda b, j: (b, 0, j))
    out = pl.pallas_call(
        _sens_reduce_kernel,
        grid=(B, pl.cdiv(HW, t)),
        in_specs=[spec, spec, spec, spec],
        out_specs=pl.BlockSpec((1, 2, t), lambda b, j: (b, 0, j)),
        out_shape=jax.ShapeDtypeStruct((B, 2, HW), jnp.float32),
        compiler_params=_cparams(("parallel", "parallel")),
    )(xr.reshape(B, C, HW), xi.reshape(B, C, HW),
      sr.reshape(B, C, HW), si.reshape(B, C, HW))
    return out.reshape(B, 2, H, W)


def _sens_expand_kernel(x_ref, sr_ref, si_ref, or_ref, oi_ref):
    x = x_ref[0]                                   # (2, t)
    xr, xi = x[0:1], x[1:2]
    sr, si = sr_ref[0], si_ref[0]                  # (C, t)
    or_ref[0] = xr * sr - xi * si
    oi_ref[0] = xr * si + xi * sr


@jax.jit
def pallas_sens_expand(x_chan, sr, si):
    """complex_mul(chan image, sens) -> split coil images (re, im)."""
    B, C, H, W = sr.shape
    HW = H * W
    t = _pick_hw_tile(HW)
    cspec = pl.BlockSpec((1, C, t), lambda b, j: (b, 0, j))
    outr, outi = pl.pallas_call(
        _sens_expand_kernel,
        grid=(B, pl.cdiv(HW, t)),
        in_specs=[pl.BlockSpec((1, 2, t), lambda b, j: (b, 0, j)), cspec, cspec],
        out_specs=[cspec, cspec],
        out_shape=(jax.ShapeDtypeStruct((B, C, HW), jnp.float32),
                   jax.ShapeDtypeStruct((B, C, HW), jnp.float32)),
        compiler_params=_cparams(("parallel", "parallel")),
    )(x_chan.reshape(B, 2, HW), sr.reshape(B, C, HW), si.reshape(B, C, HW))
    return outr.reshape(B, C, H, W), outi.reshape(B, C, H, W)


def _sens_normalize_kernel(xr_ref, xi_ref, or_ref, oi_ref):
    xr, xi = xr_ref[0], xi_ref[0]                  # (C, t)
    # NOTE: the reference divides by RSS with no epsilon; the tiny eps only
    # guards all-zero pixels against Inf/NaN propagation.
    inv = jax.lax.rsqrt(jnp.sum(xr * xr + xi * xi, axis=0, keepdims=True)
                        + _RSS_EPS)
    or_ref[0] = xr * inv
    oi_ref[0] = xi * inv


@jax.jit
def pallas_sens_normalize(yr, yi):
    """Fused y / rss(y) over the coil axis (sens-map normalization)."""
    B, C, H, W = yr.shape
    HW = H * W
    t = _pick_hw_tile(HW)
    spec = pl.BlockSpec((1, C, t), lambda b, j: (b, 0, j))
    outr, outi = pl.pallas_call(
        _sens_normalize_kernel,
        grid=(B, pl.cdiv(HW, t)),
        in_specs=[spec, spec],
        out_specs=[spec, spec],
        out_shape=(jax.ShapeDtypeStruct((B, C, HW), jnp.float32),
                   jax.ShapeDtypeStruct((B, C, HW), jnp.float32)),
        compiler_params=_cparams(("parallel", "parallel")),
    )(yr.reshape(B, C, HW), yi.reshape(B, C, HW))
    return outr.reshape(B, C, H, W), outi.reshape(B, C, H, W)


def _rss_kernel(xr_ref, xi_ref, o_ref):
    xr, xi = xr_ref[0], xi_ref[0]                  # (C, t)
    o_ref[0] = jnp.sqrt(jnp.sum(xr * xr + xi * xi, axis=0, keepdims=True))


@jax.jit
def pallas_rss(xr, xi):
    """sqrt(sum_coils |x|^2): split (B, C, H, W) planes -> (B, H, W)."""
    B, C, H, W = xr.shape
    HW = H * W
    t = _pick_hw_tile(HW)
    spec = pl.BlockSpec((1, C, t), lambda b, j: (b, 0, j))
    out = pl.pallas_call(
        _rss_kernel,
        grid=(B, pl.cdiv(HW, t)),
        in_specs=[spec, spec],
        out_specs=pl.BlockSpec((1, 1, t), lambda b, j: (b, 0, j)),
        out_shape=jax.ShapeDtypeStruct((B, 1, HW), jnp.float32),
        compiler_params=_cparams(("parallel", "parallel")),
    )(xr.reshape(B, C, HW), xi.reshape(B, C, HW))
    return out.reshape(B, H, W)


# ======================================================================
# JAX glue: FFT / crops / pooling
# ======================================================================
def ifft2c_ri(x2):
    """(..., H, W, 2) k-space -> centered orthonormal ifft as split (re, im)."""
    c = jax.lax.complex(x2[..., 0], x2[..., 1])
    c = jnp.fft.ifftshift(c, axes=(-2, -1))
    c = jnp.fft.ifft2(c, axes=(-2, -1), norm="ortho")
    c = jnp.fft.fftshift(c, axes=(-2, -1))
    return jnp.real(c).astype(jnp.float32), jnp.imag(c).astype(jnp.float32)


def fft2c_from_ri(re, im):
    """split (re, im) image -> centered orthonormal fft as (..., H, W, 2)."""
    c = jax.lax.complex(re, im)
    c = jnp.fft.ifftshift(c, axes=(-2, -1))
    c = jnp.fft.fft2(c, axes=(-2, -1), norm="ortho")
    c = jnp.fft.fftshift(c, axes=(-2, -1))
    return jnp.stack([jnp.real(c), jnp.imag(c)], axis=-1).astype(jnp.float32)


def center_crop(x, h, w):
    H, W = x.shape[-2], x.shape[-1]
    h, w = min(h, H), min(w, W)
    top, left = (H - h) // 2, (W - w) // 2
    return x[..., top:top + h, left:left + w]


def image_crop(x, crop_size):
    if crop_size is None:
        return x
    return center_crop(x, crop_size[0], crop_size[1])


def image_uncrop(image, original):
    if image.shape == original.shape:
        return image
    H, W = original.shape[-2:]
    h, w = image.shape[-2:]
    top, left = (H - h) // 2, (W - w) // 2
    return original.at[..., top:top + h, left:left + w].set(image)


def norm_stats(image_chan):
    """NormStats: per-channel mean / biased variance (requires batch == 1)."""
    b, c, h, w = image_chan.shape
    assert b == 1, "NormStats requires batch size 1 (as in the reference)."
    sums = pallas_channel_stats(image_chan)
    mean, var = _mean_var_from_sums(sums, h * w)
    return mean.reshape(1, c, 1, 1), var.reshape(1, c, 1, 1)


def avg_pool2(x):
    N, C, H, W = x.shape
    return x.reshape(N, C, H // 2, 2, W // 2, 2).mean(axis=(3, 5))


# ======================================================================
# Parameter initialization (deterministic, synthetic)
# ======================================================================
class ParamRNG:
    def __init__(self, key):
        self._key = key
        self._count = 0

    def next(self):
        self._count += 1
        return jax.random.fold_in(self._key, self._count)


def _normal(rng, shape, scale=0.05):
    return scale * jax.random.normal(rng.next(), shape, jnp.float32)


def init_conv(rng, kh, kw, cin, cout, bias=True):
    p = {"w": _normal(rng, (kh, kw, cin, cout))}
    p["b"] = _normal(rng, (cout,)) if bias else None
    return p


def init_conv_block(rng, cin, cout):
    return {"c1": init_conv(rng, 3, 3, cin, cout, bias=False),
            "c2": init_conv(rng, 3, 3, cout, cout, bias=False)}


def init_tconv_block(rng, cin, cout):
    # ConvTranspose2d(cin, cout, kernel=2, stride=2, bias=False) stored as a
    # 1x1 conv with cout*4 outputs (cout-major, then (di, dj)).
    return {"w": _normal(rng, (1, 1, cin, cout * 4))}


def init_unet(rng, in_chans, out_chans, chans, pools, final_bias):
    down = [init_conv_block(rng, in_chans, chans)]
    ch = chans
    for _ in range(pools - 1):
        down.append(init_conv_block(rng, ch, ch * 2))
        ch *= 2
    bott = init_conv_block(rng, ch, ch * 2)
    up_t, up_c = [], []
    for _ in range(pools - 1):
        up_t.append(init_tconv_block(rng, ch * 2, ch))
        up_c.append({"cb": init_conv_block(rng, ch * 2, ch)})
        ch //= 2
    up_t.append(init_tconv_block(rng, ch * 2, ch))
    up_c.append({"cb": init_conv_block(rng, ch * 2, ch),
                 "final": init_conv(rng, 1, 1, ch, out_chans, bias=final_bias)})
    return {"down": down, "bottleneck": bott, "up_t": up_t, "up_c": up_c}


def init_fivarnet(rng, *, num_cascades, sens_chans, sens_pools, chans, pools,
                  unet2d_chans, image_conv_cascades=None):
    if image_conv_cascades is None:
        image_conv_cascades = [i for i in range(num_cascades) if i % 3 == 0]
    params = {
        "sens_net": {"norm_unet": init_unet(rng, 2, 2, sens_chans, sens_pools,
                                            final_bias=True)},
        "encoder": init_conv(rng, 5, 5, 2, chans, bias=True),
        "decoder": init_conv(rng, 5, 5, chans, 2, bias=True),
        "feat_cascades": [],
        "image_cascades": [],
    }
    for ind in range(num_cascades):
        blk = {
            "dc_weight": jnp.ones((), jnp.float32),
            "feature_processor": init_unet(rng, chans, chans, unet2d_chans,
                                           pools, final_bias=False),
            "attention": {
                "q": init_conv(rng, 1, 1, chans, chans, True),
                "k": init_conv(rng, 1, 1, chans, chans, True),
                "v": init_conv(rng, 1, 1, chans, chans, True),
                "proj": init_conv(rng, 1, 1, chans, chans, True),
            },
            "use_image_conv": ind in image_conv_cascades,
        }
        if blk["use_image_conv"]:
            blk["output_conv"] = init_conv(rng, 5, 5, chans, chans, bias=False)
        params["feat_cascades"].append(blk)
    for _ in range(num_cascades):
        params["image_cascades"].append(
            {"dc_weight": jnp.ones((), jnp.float32),
             "norm_unet": init_unet(rng, 2, 2, chans, pools, final_bias=True)})
    return params


# ======================================================================
# Module forward functions (built on the Pallas kernels)
# ======================================================================
def conv_block_apply(p, x, out_dtype=MXU_DTYPE):
    # Conv -> IN -> LReLU -> Conv -> IN -> LReLU.  The first IN+LReLU is fused
    # into the second conv's input stage (no normalized-activation round trip).
    h = pallas_conv2d(x, p["c1"]["w"], out_dtype=MXU_DTYPE)
    sc1, sh1 = instance_norm_scale_shift(h)
    y = pallas_conv2d(h, p["c2"]["w"], in_scale=sc1, in_shift=sh1,
                      in_lrelu=True, out_dtype=MXU_DTYPE)
    return instance_norm(y, lrelu=True, out_dtype=out_dtype)


def tconv_block_apply(p, x, out_dtype=MXU_DTYPE):
    N, _, H, W = x.shape
    Cout = p["w"].shape[-1] // 4
    y = pallas_conv2d(x, p["w"], out_dtype=MXU_DTYPE)        # (N, 4*Cout, H, W)
    # Group-of-4 IN + LReLU before the pixel shuffle == IN + LReLU after it.
    sums = pallas_channel_stats(y)                            # (N, 4*Cout, 2)
    gsums = sums.reshape(N, Cout, 4, 2).sum(axis=2)
    mean, var = _mean_var_from_sums(gsums, 4 * H * W)
    inv = jax.lax.rsqrt(var + _IN_EPS)
    sc = jnp.repeat(inv, 4, axis=1)
    sh = jnp.repeat(-mean * inv, 4, axis=1)
    y = pallas_chan_affine(y, sc, sh, lrelu=True, out_dtype=out_dtype)
    y = y.reshape(N, Cout, 2, 2, H, W)
    y = jnp.transpose(y, (0, 1, 4, 2, 5, 3)).reshape(N, Cout, 2 * H, 2 * W)
    return y


def unet_apply(p, x, out_dtype=jnp.float32):
    stack = []
    out = x
    for blk in p["down"]:
        out = conv_block_apply(blk, out)
        stack.append(out)
        out = avg_pool2(out)
    out = conv_block_apply(p["bottleneck"], out)
    n_up = len(p["up_t"])
    for i, (tcb, u) in enumerate(zip(p["up_t"], p["up_c"])):
        last = i == n_up - 1
        skip = stack.pop()
        out = tconv_block_apply(tcb, out)
        if out.shape[-1] != skip.shape[-1]:
            out = jnp.pad(out, ((0, 0), (0, 0), (0, 0), (0, 1)), mode="reflect")
        if out.shape[-2] != skip.shape[-2]:
            out = jnp.pad(out, ((0, 0), (0, 0), (0, 1), (0, 0)), mode="reflect")
        out = jnp.concatenate([out, skip.astype(out.dtype)], axis=1)
        cb_dt = out_dtype if (last and "final" not in u) else MXU_DTYPE
        out = conv_block_apply(u["cb"], out, out_dtype=cb_dt)
        if "final" in u:
            out = pallas_conv2d(out, u["final"]["w"], u["final"]["b"],
                                out_dtype=out_dtype if last else MXU_DTYPE)
    return out


def norm_unet_apply(p, x):
    """NormUnet on channel-format complex images (N, 2, H, W)."""
    n, c, h, w = x.shape
    sums = pallas_channel_stats(x)                   # groups == channels (c==2)
    mean, var = _mean_var_from_sums(sums, h * w, ddof=1)
    std = jnp.sqrt(var)
    inv = 1.0 / std
    xn = pallas_chan_affine(x, inv, -mean * inv, out_dtype=MXU_DTYPE)
    hm = ((h - 1) | 15) + 1
    wm = ((w - 1) | 15) + 1
    hp = ((hm - h) // 2, (hm - h) - (hm - h) // 2)
    wp = ((wm - w) // 2, (wm - w) - (wm - w) // 2)
    xn = jnp.pad(xn, ((0, 0), (0, 0), hp, wp))
    y = unet_apply(p, xn, out_dtype=jnp.float32)
    y = y[:, :, hp[0]:hp[0] + h, wp[0]:wp[0] + w]
    return pallas_chan_affine(y, std, mean, out_dtype=jnp.float32)


def sens_model_apply(p, masked_kspace, mask, num_low_frequencies,
                     mask_center=True):
    B, C, H, W, _ = masked_kspace.shape
    ksp = masked_kspace
    if mask_center:
        nlf = int(num_low_frequencies)
        pad = (W - nlf + 1) // 2
        ksp = jnp.zeros_like(masked_kspace).at[:, :, :, pad:pad + nlf, :].set(
            masked_kspace[:, :, :, pad:pad + nlf, :])
    re, im = ifft2c_ri(ksp)                                # each (B, C, H, W)
    x = jnp.stack([re, im], axis=2).reshape(B * C, 2, H, W)
    y = norm_unet_apply(p["norm_unet"], x)                 # (B*C, 2, H, W)
    yr = y[:, 0].reshape(B, C, H, W)
    yi = y[:, 1].reshape(B, C, H, W)
    return pallas_sens_normalize(yr, yi)                   # fused y / rss(y)


def feature_encoder_apply(p, image, means, variances):
    # (image - mean) * rsqrt(var) fused into the conv input stage; zero padding
    # is applied AFTER the normalization, exactly as in the reference.
    N, Cin = image.shape[:2]
    inv = jax.lax.rsqrt(variances).reshape(1, Cin)
    mean = means.reshape(1, Cin)
    sc = jnp.broadcast_to(inv, (N, Cin))
    sh = jnp.broadcast_to(-mean * inv, (N, Cin))
    return pallas_conv2d(image, p["w"], p["b"], in_scale=sc, in_shift=sh,
                         out_dtype=jnp.float32)


def feature_decoder_apply(p, features, means, variances,
                          in_scale=None, in_shift=None):
    # Output affine (*sqrt(var) + mean) folded exactly into weights/bias.
    std = jnp.sqrt(variances).reshape(-1)
    mean = means.reshape(-1)
    w = p["w"] * std[None, None, None, :]
    b = p["b"] * std + mean
    return pallas_conv2d(features, w, b, in_scale=in_scale, in_shift=in_shift,
                         out_dtype=jnp.float32)


def attention_pe_apply(p, x, accel):
    B, C, H, W = x.shape
    scale = float(C) ** (-0.5)
    # Fold the 1/sqrt(C) attention scale into the q projection.
    wqkv = jnp.concatenate([p["q"]["w"] * scale, p["k"]["w"], p["v"]["w"]],
                           axis=-1)
    bqkv = jnp.concatenate([p["q"]["b"] * scale, p["k"]["b"], p["v"]["b"]],
                           axis=0)
    # InstanceNorm of x fused into the single qkv 1x1 conv (Cout = 3*C).
    in_sc, in_sh = instance_norm_scale_shift(x)
    qkv = pallas_conv2d(x, wqkv, bqkv, in_scale=in_sc, in_shift=in_sh,
                        out_dtype=MXU_DTYPE)               # (B, 3C, H, W)
    q, k, v = jnp.split(qkv, 3, axis=1)
    Wd = W // accel

    def to_cl(z):                                          # -> (B*accel, C, L)
        z = z.reshape(B, C, H, Wd, accel)
        return jnp.transpose(z, (0, 4, 1, 2, 3)).reshape(B * accel, C, H * Wd)

    h2 = pallas_attention(to_cl(q), to_cl(k), to_cl(v))    # (BA, C, L) bf16
    h2 = jnp.transpose(h2.reshape(B, accel, C, H, Wd),
                       (0, 2, 3, 4, 1)).reshape(B, C, H, W)
    h2 = pallas_conv2d(h2, p["proj"]["w"], p["proj"]["b"],
                       out_dtype=jnp.float32)
    return x + h2


def attention_feat_block_apply(p, enc_p, dec_p, fi, accel):
    features = instance_norm(fi["features"], out_dtype=jnp.float32)  # input_norm
    features = attention_pe_apply(p["attention"], features, accel)
    fi = dict(fi, features=features)
    # data-consistency term
    est_image = feature_decoder_apply(dec_p, fi["features"], fi["means"],
                                      fi["variances"])
    er, ei = pallas_sens_expand(est_image, fi["sr"], fi["si"])
    est_kspace = fft2c_from_ri(er, ei)
    resid = jnp.where(fi["mask"], est_kspace - fi["ref_kspace"], 0.0)
    rr, ri_ = ifft2c_ri(resid)
    red = pallas_sens_reduce(rr, ri_, fi["sr"], fi["si"])
    dc = p["dc_weight"] * feature_encoder_apply(enc_p, red, fi["means"],
                                                fi["variances"])
    new_features = fi["features"] - dc
    # feature-processor (Unet2d) term, with crop/uncrop
    proc = unet_apply(p["feature_processor"],
                      image_crop(fi["features"], fi["crop_size"]),
                      out_dtype=jnp.float32)
    proc = image_uncrop(proc, fi["features"])
    new_features = new_features - proc
    if p["use_image_conv"]:
        new_features = instance_norm(new_features, out_dtype=jnp.float32)
        conv_out = pallas_conv2d(new_features, p["output_conv"]["w"],
                                 out_dtype=MXU_DTYPE)
        conv_out = instance_norm(conv_out, lrelu=True, out_dtype=jnp.float32)
        new_features = new_features + conv_out
    return dict(fi, features=new_features)


def varnet_block_apply(p, current_kspace, ref_kspace, mask, sr, si):
    soft_dc = jnp.where(mask, current_kspace - ref_kspace, 0.0) * p["dc_weight"]
    xr, xi = ifft2c_ri(current_kspace)
    img = pallas_sens_reduce(xr, xi, sr, si)                 # (B, 2, H, W)
    model = norm_unet_apply(p["norm_unet"], img)
    mr, mi = pallas_sens_expand(model, sr, si)
    model_kspace = fft2c_from_ri(mr, mi)
    return current_kspace - soft_dc - model_kspace


def fivarnet_apply(params, masked_kspace, mask, num_low_frequencies, *,
                   acceleration, crop_size=(450, 450),
                   kspace_mult_factor=1e6, mask_center=True):
    masked_kspace = masked_kspace * kspace_mult_factor
    # _encode_input
    sr, si = sens_model_apply(params["sens_net"], masked_kspace, mask,
                              num_low_frequencies, mask_center=mask_center)
    xr, xi = ifft2c_ri(masked_kspace)
    image = pallas_sens_reduce(xr, xi, sr, si)               # (1, 2, H, W)
    h, w = image.shape[-2:]
    cs = None if crop_size is None else (min(h, crop_size[0]),
                                         min(w, crop_size[1]))
    means, variances = norm_stats(image)
    features = feature_encoder_apply(params["encoder"], image, means, variances)
    fi = dict(features=features, sr=sr, si=si, crop_size=cs,
              means=means, variances=variances, mask=mask,
              ref_kspace=masked_kspace)
    # feature cascades
    for blk in params["feat_cascades"]:
        fi = attention_feat_block_apply(blk, params["encoder"],
                                        params["decoder"], fi, acceleration)
    # _decode_output: decode_norm fused into the decoder conv's input stage
    dec_sc, dec_sh = instance_norm_scale_shift(fi["features"])
    img_dec = feature_decoder_apply(params["decoder"], fi["features"],
                                    fi["means"], fi["variances"],
                                    in_scale=dec_sc, in_shift=dec_sh)
    kr, ki = pallas_sens_expand(img_dec, fi["sr"], fi["si"])
    kspace_pred = fft2c_from_ri(kr, ki)
    # image-space cascades
    for blk in params["image_cascades"]:
        kspace_pred = varnet_block_apply(blk, kspace_pred, fi["ref_kspace"],
                                         mask, fi["sr"], fi["si"])
    kspace_pred = kspace_pred / kspace_mult_factor
    fr, fim = ifft2c_ri(kspace_pred)
    img = pallas_rss(fr, fim)                                # rss(|ifft|, dim=1)
    # Reference hard-codes center_crop(img, 384, 384); clamped to image size.
    img = center_crop(img, 384, 384)
    return img


# ======================================================================
# Demo
# ======================================================================
if __name__ == "__main__":
    B, C, H, W = 1, 4, 16, 16            # batch must be 1 (NormStats contract)
    accel = 4
    nlf = 4                              # num_low_frequencies

    key = jax.random.PRNGKey(0)
    k_data, k_param = jax.random.split(key)

    # undersampling mask: every accel-th column + fully-sampled center
    col = jnp.arange(W)
    center = W // 2
    m = (col % accel == 0) | ((col >= center - nlf // 2) &
                              (col < center + (nlf + 1) // 2))
    mask = m.reshape(1, 1, 1, W, 1)

    full_kspace = 1e-4 * jax.random.normal(k_data, (B, C, H, W, 2), jnp.float32)
    masked_kspace = jnp.where(mask, full_kspace, 0.0)

    rng = ParamRNG(k_param)
    params = init_fivarnet(rng, num_cascades=2, sens_chans=4, sens_pools=2,
                           chans=8, pools=2, unet2d_chans=8)

    out = fivarnet_apply(params, masked_kspace, mask, nlf,
                         acceleration=accel, crop_size=(450, 450))
    out = jax.block_until_ready(out)

    assert out.shape == (B, H, W), out.shape
    assert bool(jnp.all(jnp.isfinite(out)))
    print("KERNEL_OK")
</pallas_src>

<mosaic_0001>
module attributes {stable_mosaic.version = 11 : i64} {
  func.func @_stats_kernel(%arg0: i32, %arg1: i32, %arg2: memref<1x2x128xf32, #tpu.memory_space<vmem>>, %arg3: memref<1x1x2x2xf32, #tpu.memory_space<vmem>>) attributes {dimension_semantics = [#tpu.dimension_semantics<parallel>, #tpu.dimension_semantics<parallel>], iteration_bounds = array<i64: 4, 2>, scalar_prefetch = 0 : i64, scratch_operands = 0 : i64, tpu.core_type = #tpu.core_type<tc>, window_params = [{transform_indices = @transform_0, window_bounds = array<i64: 1, 2, 128>}, {transform_indices = @transform_1, window_bounds = array<i64: 1, 1, 2, 2>}]} {
    %c0 = arith.constant 0 : index
    %c0_0 = arith.constant 0 : index
    %c0_1 = arith.constant 0 : index
    %0 = vector.load %arg2[%c0, %c0_0, %c0_1] : memref<1x2x128xf32, #tpu.memory_space<vmem>>, vector<1x2x128xf32>
    %1 = vector.shape_cast %0 : vector<1x2x128xf32> to vector<2x128xf32>
    %cst = arith.constant dense<0.000000e+00> : vector<2xf32>
    %2 = vector.multi_reduction <add>, %1, %cst [1] : vector<2x128xf32> to vector<2xf32>
    %3 = vector.shape_cast %2 : vector<2xf32> to vector<2x1xf32>
    %4 = arith.mulf %1, %1 : vector<2x128xf32>
    %cst_2 = arith.constant dense<0.000000e+00> : vector<2xf32>
    %5 = vector.multi_reduction <add>, %4, %cst_2 [1] : vector<2x128xf32> to vector<2xf32>
    %6 = vector.shape_cast %5 : vector<2xf32> to vector<2x1xf32>
    %7 = tpu.concatenate %3, %6 in 1 : vector<2x1xf32>, vector<2x1xf32> -> vector<2x2xf32>
    %c0_3 = arith.constant 0 : index
    %c0_4 = arith.constant 0 : index
    %c0_5 = arith.constant 0 : index
    %c0_6 = arith.constant 0 : index
    %8 = vector.load %arg3[%c0_3, %c0_4, %c0_5, %c0_6] : memref<1x1x2x2xf32, #tpu.memory_space<vmem>>, vector<1x1x2x2xf32>
    %9 = vector.shape_cast %8 : vector<1x1x2x2xf32> to vector<2x2xf32>
    %10 = vector.shape_cast %7 : vector<2x2xf32> to vector<1x1x2x2xf32>
    tpu.vector_store %arg3[%c0_3, %c0_4, %c0_5, %c0_6], %10 {strides = array<i32>} : memref<1x1x2x2xf32, #tpu.memory_space<vmem>>, vector<1x1x2x2xf32>,
    return
  }
  func.func @transform_0(%arg0: i32, %arg1: i32) -> (i32, i32, i32) {
    %c0_i32 = arith.constant 0 : i32
    %c0_i32_0 = arith.constant 0 : i32
    return %arg0, %c0_i32, %arg1 : i32, i32, i32
  }
  func.func @transform_1(%arg0: i32, %arg1: i32) -> (i32, i32, i32, i32) {
    %c0_i32 = arith.constant 0 : i32
    %c0_i32_0 = arith.constant 0 : i32
    %c0_i32_1 = arith.constant 0 : i32
    return %arg0, %arg1, %c0_i32, %c0_i32_0 : i32, i32, i32, i32
  }
}

</mosaic_0001>

<bundles_post_ra>
// kernel: pallas_channel_stats.1
= control target key start
LH: loop header
LB: loop body
LE: loop exit
PB: predicated region body
PF: predicated region fallthrough
CT: control target
= control target key end

     0   :  { %s348_s6 = smov 0   ;;  %s350_s7 = smov 0   ;;  %s399_s0 = inlined_call_operand.vmem [shape: f32[4,2,256], index: 0, kind: input, shape index: {}]   ;;  %s400_s1 = inlined_call_operand.vmem [shape: f32[4,2,2,2], index: 1, kind: output, shape index: {}]  }
   0x1   :  { %s352_s8 = smov 0   ;;  %s354_s9 = smov 0  }
   0x2   :  { %s356_s10 = smov 0  }
   0x3 LB: > { %s20_s11 = sadd.s32 1, %s328_s8  ;;  %s23_s12 = sadd.s32 1, %s332_s9  ;;  %s336_s10 = sphi %s356_s10, %s11_s10   ;;  %s332_s9 = sphi %s354_s9, %s404_s9   ;;  %s328_s8 = sphi %s352_s8, %s403_s8   ;;  %s324_s7 = sphi %s350_s7, %s402_s7   ;;  %s320_s6 = sphi %s348_s6, %s401_s6  }
   0x4   : > { %p21_p0 = scmp.ge.s32.totalorder %s20_s11, 2  ;;  %p251_p1 = scmp.ge.s32.totalorder %s336_s10, 1 }
   0x5   : > { %p106_p2 = scmp.lt.s32.totalorder %s336_s10, 9 }
   0x6   : > { %s406_s11 = smov (%p21_p0, %s20_s11), 0  ;;  %s408_s12 = smov (!%p21_p0, %s23_s12), %s332_s9 }
   0x7   : > { %p107_p3 = pnand %p251_p1, %p106_p2  ;;  %p25_p4 = scmp.ge.s32.totalorder %s408_s12, 4 }
   0x8   : > { %p132_p5 = scmp.lt.s32.totalorder (!%p107_p3), %s324_s7, 3  ;;  %p134_p6 = scmp.lt.s32.totalorder (!%p107_p3), %s320_s6, 1 }
   0x9   : > { %s410_s12 = smov (%p25_p4, %s408_s12), 0  ;;  %110 = sbr.rel (%p107_p3) target bundleno = 165 (0xa5), region = 24 }
   0xe   : > { %s412_s7 = smov (!%p132_p5, %s324_s7), 3  ;;  %s414_s6 = smov (!%p134_p6, %s320_s6), 1  ;;  %vm149_vm0 = vcmask 1041408   ;;  %vm157_vm1 = vcmask 7168   ;;  %vm159_vm2 = vcmask 9216  }
   0xf   : > { %s252_s13 = sshll.u32 %s412_s7, 1 }
  0x10   : > { %s137_s14 = sadd.s32 %s252_s13, %s414_s6 }
  0x11   : > { %s253_s15 = sshll.u32 %s137_s14, 1 }
  0x12   : > { %s139_s18 = scalar_lea.vmem %s399_s0, %s253_s15  ;;  %s147_s21 = scalar_lea.vmem %s400_s1, %s253_s15 }
  0x13   : > { %v148_v0 = vld [vmem:[%s139_s18] sm:$0x3] }
  0x14   : > { %v150_v1 = vsel %vm149_vm0, %v148_v0, 0.0  ;;  %v153_v2 = vmul.f32 %v148_v0, %v148_v0 }
  0x15   : > { %151 = vadd.xlane.f32.xlu0 %v150_v1 }
  0x16   : > { %v154_v3 = vsel %vm149_vm0, %v153_v2, 0.0 }
  0x19   : > { %155 = vadd.xlane.f32.xlu0 %v154_v3 }
  0x9e   : > { %v152_v4 = vpop.xlane.xlu0 %151 }
  0xa2   : > { %v156_v5 = vpop.xlane.xlu0 %155 }
  0xa3   : > { %v158_v6 = vsel %vm157_vm1, %v152_v4, %v156_v5 }
  0xa4   : > { %160 = vst.msk [vmem:[%s147_s21] sm:$0x3] %vm159_vm2, %v158_v6 }
  0xa5 PF: > { %s11_s10 = sadd.s32 1, %s336_s10   ;;  %s401_s6 = smov %s328_s8 }
  0xa6   : > { %p8_p7 = scmp.ge.s32.totalorder %s11_s10, 10   ;;  %s402_s7 = smov %s332_s9 }
  0xa7   : > { %s403_s8 = smov %s406_s11  ;;  %s404_s9 = smov %s410_s12 }
  0xa8   :  { %10 = sbr.rel (!%p8_p7) target bundleno = 3 (0x3), region = 54 }

</bundles_post_ra>
